<compile_context>
chip_gen: v7x
topology: tpu7x:2x2x1
jax: 0.10.0
libtpu: 0.0.40
codegen_flags: <defaults>
</compile_context>

<pallas_src>
import functools
from typing import Any, List, NamedTuple, Tuple

import jax
import jax.numpy as jnp
from jax.experimental import pallas as pl
from jax.experimental.pallas import tpu as pltpu


# ---------------------------------------------------------------------------
# Small helpers
# ---------------------------------------------------------------------------
def _round_up(n: int, m: int) -> int:
    return ((n + m - 1) // m) * m


def _pad_input(x, rows: int, cols: int):
    B, D = x.shape
    if (rows, cols) == (B, D):
        return x
    return jnp.zeros((rows, cols), x.dtype).at[:B, :D].set(x)


def _choose_batch_tile(B: int, max_tile: int, row_align: int) -> int:
    """Pick a batch tile: aligned rows, >=2 grid steps when possible, even step count."""
    max_tile = max(row_align, _round_up(min(max_tile, B), row_align))
    steps = pl.cdiv(B, max_tile)
    if steps == 1 and B > row_align:
        steps = 2                       # keep both v7x TensorCores busy
    if steps > 1 and steps % 2 == 1:
        steps += 1                      # even step count -> no megacore tail imbalance
    return _round_up(pl.cdiv(B, steps), row_align)


def _clamp_vmem(est_bytes: int) -> int:
    # Never go below the default scoped limit (would risk compile failure); cap at the
    # smallest physical VMEM among targets (v7x: 64 MiB per TC).
    return int(min(max(2 * est_bytes + (4 << 20), 32 << 20), 64 << 20))


# ---------------------------------------------------------------------------
# One-time probe: is pipeline_mode=pl.Buffered(1) supported (single-buffer the
# never-changing weights)?  Falls back to default double-buffering otherwise.
# ---------------------------------------------------------------------------
_BUFFERED_WEIGHTS_OK = None


def _probe_buffered_weights() -> bool:
    global _BUFFERED_WEIGHTS_OK
    if _BUFFERED_WEIGHTS_OK is not None:
        return _BUFFERED_WEIGHTS_OK

    def _probe_kernel(x_ref, o_ref):
        o_ref[...] = x_ref[...] + 1.0

    try:
        x = jnp.arange(8 * 128, dtype=jnp.float32).reshape(8, 128)
        y = pl.pallas_call(
            _probe_kernel,
            out_shape=jax.ShapeDtypeStruct((8, 128), jnp.float32),
            grid=(2,),
            in_specs=[pl.BlockSpec((8, 128), lambda i: (0, 0),
                                   pipeline_mode=pl.Buffered(buffer_count=1))],
            out_specs=pl.BlockSpec((8, 128), lambda i: (0, 0)),
        )(x)
        _BUFFERED_WEIGHTS_OK = bool(jnp.allclose(jax.block_until_ready(y), x + 1.0))
    except Exception:
        _BUFFERED_WEIGHTS_OK = False
    return _BUFFERED_WEIGHTS_OK


def _resident_spec(shape):
    """BlockSpec for an array that stays resident in VMEM across the whole grid."""
    index_map = lambda *_: (0,) * len(shape)
    if _probe_buffered_weights():
        return pl.BlockSpec(shape, index_map,
                            pipeline_mode=pl.Buffered(buffer_count=1))
    return pl.BlockSpec(shape, index_map)


# ---------------------------------------------------------------------------
# Kernels
# ---------------------------------------------------------------------------
def _silu_f32(y):
    # SiLU: y * sigmoid(y); sigmoid(y) = 0.5*(tanh(y/2)+1): one EUP op, stable, f32.
    return y * (0.5 * (jnp.tanh(0.5 * y) + 1.0))


def _fused_mlp_kernel(*refs, n_hidden, use_bn, bn_eps, compute_dtype):
    """Whole network in one kernel. refs = (x, w0, b0, ..., w_out, b_out, out)."""
    x_ref = refs[0]
    o_ref = refs[-1]
    wb = refs[1:-1]

    h = x_ref[...].astype(compute_dtype)
    for i in range(n_hidden + 1):
        w = wb[2 * i][...]                             # [Din_pad, Dout_pad] compute dtype
        b = wb[2 * i + 1][...]                         # [1, Dout_pad] f32
        y = jnp.dot(h, w, preferred_element_type=jnp.float32) + b.astype(jnp.float32)
        if i < n_hidden:
            y = _silu_f32(y)
            if use_bn:
                # Exact full-batch stats (b_tile == B); centered two-pass variance.
                mean = jnp.mean(y, axis=0, keepdims=True)
                c = y - mean
                var = jnp.mean(c * c, axis=0, keepdims=True)
                y = c * jax.lax.rsqrt(var + bn_eps)
            h = y.astype(compute_dtype)
        else:
            o_ref[...] = y.astype(o_ref.dtype)


def _bn_stage_kernel(*refs, normalize, apply_silu, emit_stats,
                     compute_dtype, valid_rows, block_rows):
    """One stage of the staged BN path:
       [h = a*scale + shift]  ->  Linear  ->  [SiLU]  ->  out (+ masked partial stats).
    """
    idx = 0
    a_ref = refs[idx]; idx += 1
    if normalize:
        scale_ref = refs[idx]; shift_ref = refs[idx + 1]; idx += 2
    w_ref = refs[idx]; b_ref = refs[idx + 1]; idx += 2
    out_ref = refs[idx]; idx += 1
    stats_ref = refs[idx] if emit_stats else None

    h = a_ref[...].astype(jnp.float32)
    if normalize:
        h = h * scale_ref[...] + shift_ref[...]        # BN of the previous layer (f32)
    y = jnp.dot(h.astype(compute_dtype), w_ref[...],
                preferred_element_type=jnp.float32) + b_ref[...].astype(jnp.float32)
    if apply_silu:
        y = _silu_f32(y)
    out_ref[...] = y.astype(out_ref.dtype)

    if emit_stats:
        # Per-tile partial sums for this layer's BN, masking padded batch rows.
        start = pl.program_id(0) * block_rows
        rows = jax.lax.broadcasted_iota(jnp.int32, (block_rows, 1), 0) + start
        m = (rows < valid_rows).astype(jnp.float32)    # [bt, 1]
        ym = y * m
        s1 = jnp.sum(ym, axis=0, keepdims=True)        # [1, d]
        s2 = jnp.sum(ym * y, axis=0, keepdims=True)    # [1, d]
        pad = jnp.zeros((6, s1.shape[1]), jnp.float32)
        stats_ref[...] = jnp.concatenate([s1, s2, pad], axis=0)[None]   # [1, 8, d]


# ---------------------------------------------------------------------------
# Parameter preparation (done ONCE, reused across forward calls)
# ---------------------------------------------------------------------------
class PreparedMLP(NamedTuple):
    weights: Tuple            # ((w_pad[in,out], b_pad[1,out]), ...) pre-transposed
    dims: Tuple[int, ...]     # true feature dims: (d_in, w0, ..., d_out)
    compute_dtype: Any


def prepare_params(params, dim: int, compute_dtype=jnp.bfloat16, lane: int = 128):
    """Pre-transpose nn.Linear weights (out,in)->(in,out), cast to compute dtype, and
    zero-pad every feature dim to a multiple of `lane` (lane-dense, full MXU width)."""
    dims = [dim] + [int(w.shape[0]) for w, _ in params]
    prepared = []
    in_dim, in_pad = dim, _round_up(dim, lane)
    for w, b in params:
        out_dim = int(w.shape[0])
        out_pad = _round_up(out_dim, lane)
        w_t = jnp.zeros((in_pad, out_pad), compute_dtype).at[:in_dim, :out_dim].set(
            w.T.astype(compute_dtype))
        b_p = jnp.zeros((1, out_pad), jnp.float32).at[:, :out_dim].set(
            b.astype(jnp.float32))
        prepared.append((w_t, b_p))
        in_dim, in_pad = out_dim, out_pad
    return PreparedMLP(weights=tuple(prepared), dims=tuple(dims),
                       compute_dtype=compute_dtype)


# ---------------------------------------------------------------------------
# Forward paths
# ---------------------------------------------------------------------------
def _fused_forward(x, weights, use_bn, bn_eps, compute_dtype, b_tile):
    B = x.shape[0]
    n_hidden = len(weights) - 1
    d_in_pad = weights[0][0].shape[0]
    d_out_pad = weights[-1][0].shape[1]
    b_pad = _round_up(B, b_tile)
    n_steps = b_pad // b_tile
    x_p = _pad_input(x, b_pad, d_in_pad)
    flat_wb = [a for wb in weights for a in wb]

    in_specs = [pl.BlockSpec((b_tile, d_in_pad), lambda i: (i, 0))]
    in_specs += [_resident_spec(a.shape) for a in flat_wb]
    out_specs = pl.BlockSpec((b_tile, d_out_pad), lambda i: (i, 0))

    w_bytes = sum(int(a.size) * a.dtype.itemsize for a in flat_wb)
    w_resident = w_bytes * (1 if _probe_buffered_weights() else 2)
    max_pad = max(max(w.shape) for w, _ in weights)
    est = (2 * b_tile * (d_in_pad + d_out_pad) * x.dtype.itemsize
           + 4 * b_tile * max_pad * 4 + w_resident)

    flops = 2 * b_pad * sum(int(w.shape[0]) * int(w.shape[1]) for w, _ in weights)
    transc = b_pad * sum(int(w.shape[1]) for w, _ in weights[:-1])
    nbytes = (int(x_p.size) * x_p.dtype.itemsize + w_bytes
              + b_pad * d_out_pad * x.dtype.itemsize)

    kernel = functools.partial(_fused_mlp_kernel, n_hidden=n_hidden, use_bn=use_bn,
                               bn_eps=bn_eps, compute_dtype=compute_dtype)
    return pl.pallas_call(
        kernel,
        out_shape=jax.ShapeDtypeStruct((b_pad, d_out_pad), x.dtype),
        grid=(n_steps,),
        in_specs=in_specs,
        out_specs=out_specs,
        compiler_params=pltpu.CompilerParams(
            dimension_semantics=("parallel",),
            vmem_limit_bytes=_clamp_vmem(est)),
        cost_estimate=pl.CostEstimate(flops=flops, transcendentals=transc,
                                      bytes_accessed=nbytes),
    )(x_p, *flat_wb)


def _staged_bn_forward(x, weights, bn_eps, compute_dtype, b_tile):
    """Two-sweep BN scheme with a tiled, 'parallel' batch grid: each stage kernel emits
    per-tile masked (sum, sumsq) partials; mean/var are finalized between stages."""
    B = x.shape[0]
    n_hidden = len(weights) - 1
    d_in_pad = weights[0][0].shape[0]
    b_pad = _round_up(B, b_tile)
    n_tiles = b_pad // b_tile
    act_dtype = compute_dtype

    h = _pad_input(x, b_pad, d_in_pad)
    scale = shift = None

    for i, (w, b) in enumerate(weights):
        last = (i == n_hidden)
        d_prev_pad = h.shape[1]
        d_out_pad = w.shape[1]
        normalize = i > 0
        emit_stats = not last
        apply_silu = not last

        in_arrays = [h]
        in_specs = [pl.BlockSpec((b_tile, d_prev_pad), lambda t: (t, 0))]
        if normalize:
            in_arrays += [scale, shift]
            in_specs += [_resident_spec(scale.shape), _resident_spec(shift.shape)]
        in_arrays += [w, b]
        in_specs += [_resident_spec(w.shape), _resident_spec(b.shape)]

        out_dtype = x.dtype if last else act_dtype
        out_shapes = [jax.ShapeDtypeStruct((b_pad, d_out_pad), out_dtype)]
        out_specs = [pl.BlockSpec((b_tile, d_out_pad), lambda t: (t, 0))]
        if emit_stats:
            out_shapes.append(jax.ShapeDtypeStruct((n_tiles, 8, d_out_pad), jnp.float32))
            out_specs.append(pl.BlockSpec((1, 8, d_out_pad), lambda t: (t, 0, 0)))

        w_bytes = int(w.size) * w.dtype.itemsize + int(b.size) * b.dtype.itemsize
        w_resident = w_bytes * (1 if _probe_buffered_weights() else 2)
        est = (2 * b_tile * d_prev_pad * jnp.dtype(h.dtype).itemsize
               + 2 * b_tile * d_out_pad * jnp.dtype(out_dtype).itemsize
               + 2 * b_tile * d_out_pad * 4 + 2 * 8 * d_out_pad * 4 + w_resident)

        kernel = functools.partial(
            _bn_stage_kernel, normalize=normalize, apply_silu=apply_silu,
            emit_stats=emit_stats, compute_dtype=compute_dtype,
            valid_rows=B, block_rows=b_tile)

        outs = pl.pallas_call(
            kernel,
            out_shape=out_shapes,
            grid=(n_tiles,),
            in_specs=in_specs,
            out_specs=out_specs,
            compiler_params=pltpu.CompilerParams(
                dimension_semantics=("parallel",),
                vmem_limit_bytes=_clamp_vmem(est)),
        )(*in_arrays)

        if emit_stats:
            h, stats = outs[0], outs[1]
            ssum = jnp.sum(stats[:, 0, :], axis=0)
            ssq = jnp.sum(stats[:, 1, :], axis=0)
            mean = ssum / B
            var = jnp.maximum(ssq / B - mean * mean, 0.0)
            scale = jax.lax.rsqrt(var + bn_eps).reshape(1, -1).astype(jnp.float32)
            shift = (-mean).reshape(1, -1).astype(jnp.float32) * scale
        else:
            h = outs[0]
    return h


def mlp_apply(x, prep: PreparedMLP, use_bn: bool = False, bn_eps: float = 1e-5,
              batch_tile: int = 512, bn_impl: str = "auto"):
    """Forward pass matching MLP.forward. x: [B, dim]; prep from prepare_params()."""
    B, d_in = x.shape
    assert d_in == prep.dims[0], "input feature dim mismatch"
    weights = list(prep.weights)
    cdt = prep.compute_dtype
    d_out = prep.dims[-1]
    row_align = 16 if (jnp.dtype(cdt) == jnp.dtype(jnp.bfloat16)
                       or x.dtype == jnp.dtype(jnp.bfloat16)) else 8

    if use_bn and bn_impl == "auto":
        max_pad = max(max(w.shape) for w, _ in weights)
        # fused single-call needs the full batch's f32 activations live in VMEM.
        bn_impl = "fused" if B * max_pad * 4 * 6 <= (16 << 20) else "staged"

    if not use_bn:
        b_tile = _choose_batch_tile(B, batch_tile, row_align)
        out_p = _fused_forward(x, weights, False, bn_eps, cdt, b_tile)
    elif bn_impl == "fused":
        out_p = _fused_forward(x, weights, True, bn_eps, cdt, B)   # exact batch stats
    else:
        b_tile = _choose_batch_tile(B, batch_tile, row_align)
        out_p = _staged_bn_forward(x, weights, bn_eps, cdt, b_tile)
    return out_p[:B, :d_out]


def mlp_forward(x, params, use_bn: bool = False, bn_eps: float = 1e-5,
                batch_tile: int = 512, compute_dtype=jnp.bfloat16, bn_impl: str = "auto"):
    """Convenience wrapper. Prefer prepare_params() once + mlp_apply() in hot loops."""
    prep = prepare_params(params, x.shape[1], compute_dtype=compute_dtype)
    return mlp_apply(x, prep, use_bn=use_bn, bn_eps=bn_eps,
                     batch_tile=batch_tile, bn_impl=bn_impl)


# ---------------------------------------------------------------------------
# Parameter init (mirrors nn.Linear shapes: weight (out, in), bias (out,)) + reference
# ---------------------------------------------------------------------------
def init_mlp_params(key, dim: int, widths):
    params = []
    in_dim = dim
    for out_dim in list(widths) + [dim]:
        key, kw, kb = jax.random.split(key, 3)
        bound = 1.0 / jnp.sqrt(in_dim)
        w = jax.random.uniform(kw, (out_dim, in_dim), jnp.float32, -bound, bound)
        b = jax.random.uniform(kb, (out_dim,), jnp.float32, -bound, bound)
        params.append((w, b))
        in_dim = out_dim
    return params


def mlp_reference(x, params, use_bn: bool = False, bn_eps: float = 1e-5):
    h = x
    for w, b in params[:-1]:
        h = h @ w.T + b
        h = h * jax.nn.sigmoid(h)
        if use_bn:
            mean = jnp.mean(h, axis=0, keepdims=True)
            var = jnp.mean((h - mean) ** 2, axis=0, keepdims=True)
            h = (h - mean) / jnp.sqrt(var + bn_eps)
    w, b = params[-1]
    return h @ w.T + b


# ---------------------------------------------------------------------------
if __name__ == "__main__":
    dim = 16
    widths = [32, 32]

    key = jax.random.PRNGKey(0)
    key, kx1, kx2 = jax.random.split(key, 3)
    params = init_mlp_params(key, dim, widths)

    x_small = jax.random.normal(kx1, (8, dim), jnp.float32)
    x_big = jax.random.normal(kx2, (200, dim), jnp.float32)

    # Prepared (pre-transposed / padded / cast) weights are built ONCE and reused.
    prep_f32 = prepare_params(params, dim, compute_dtype=jnp.float32)
    prep_bf16 = prepare_params(params, dim)          # default: bf16 weights/activations

    # 1) f32, no BN, single tile.
    out = jax.block_until_ready(mlp_apply(x_small, prep_f32, use_bn=False))
    ref = mlp_reference(x_small, params, use_bn=False)
    assert out.shape == (8, dim)
    assert jnp.allclose(out, ref, atol=1e-4, rtol=1e-4), "mismatch: f32 / no BN"

    # 2) f32, no BN, multiple batch tiles (row padding + parallel grid exercised).
    out = jax.block_until_ready(mlp_apply(x_big, prep_f32, use_bn=False, batch_tile=64))
    ref = mlp_reference(x_big, params, use_bn=False)
    assert jnp.allclose(out, ref, atol=1e-4, rtol=1e-4), "mismatch: f32 / no BN / tiled"

    # 3) f32, BN, small batch -> fully fused single-call path (exact batch stats).
    out = jax.block_until_ready(mlp_apply(x_small, prep_f32, use_bn=True))
    ref = mlp_reference(x_small, params, use_bn=True)
    assert jnp.allclose(out, ref, atol=1e-3, rtol=1e-3), "mismatch: f32 / BN fused"

    # 4) f32, BN, staged two-sweep path (tiled batch, masked partial stats).
    out = jax.block_until_ready(
        mlp_apply(x_big, prep_f32, use_bn=True, batch_tile=64, bn_impl="staged"))
    ref = mlp_reference(x_big, params, use_bn=True)
    assert jnp.allclose(out, ref, atol=1e-3, rtol=1e-3), "mismatch: f32 / BN staged"

    # 5) bf16 compute dtype (MXU-native weights/activations, f32 accumulation).
    out = jax.block_until_ready(mlp_apply(x_big, prep_bf16, use_bn=False, batch_tile=64))
    ref = mlp_reference(x_big, params, use_bn=False)
    assert jnp.allclose(out, ref, atol=5e-2, rtol=5e-2), "mismatch: bf16 / no BN"

    print("KERNEL_OK")
</pallas_src>

<mosaic_0001>
module attributes {stable_mosaic.version = 11 : i64} {
  func.func @_probe_kernel(%arg0: i32, %arg1: memref<8x128xf32, #tpu.memory_space<vmem>>, %arg2: memref<8x128xf32, #tpu.memory_space<vmem>>) attributes {dimension_semantics = [#tpu.dimension_semantics<arbitrary>], iteration_bounds = array<i64: 2>, scalar_prefetch = 0 : i64, scratch_operands = 0 : i64, tpu.core_type = #tpu.core_type<tc>, window_params = [{pipeline_mode = #tpu.pipeline_mode<synchronous>, transform_indices = @transform_0, window_bounds = array<i64: 8, 128>}, {pipeline_mode = #tpu.pipeline_mode<synchronous>, transform_indices = @transform_1, window_bounds = array<i64: 8, 128>}]} {
    %c0 = arith.constant 0 : index
    %c0_0 = arith.constant 0 : index
    %0 = vector.load %arg1[%c0, %c0_0] : memref<8x128xf32, #tpu.memory_space<vmem>>, vector<8x128xf32>
    %cst = arith.constant 1.000000e+00 : f32
    %1 = vector.broadcast %cst : f32 to vector<8x128xf32>
    %2 = arith.addf %0, %1 : vector<8x128xf32>
    %c0_1 = arith.constant 0 : index
    %c0_2 = arith.constant 0 : index
    %3 = vector.load %arg2[%c0_1, %c0_2] : memref<8x128xf32, #tpu.memory_space<vmem>>, vector<8x128xf32>
    tpu.vector_store %arg2[%c0_1, %c0_2], %2 {strides = array<i32>} : memref<8x128xf32, #tpu.memory_space<vmem>>, vector<8x128xf32>,
    return
  }
  func.func @transform_0(%arg0: i32) -> (i32, i32) {
    %c0_i32 = arith.constant 0 : i32
    %c0_i32_0 = arith.constant 0 : i32
    %c0_i32_1 = arith.constant 0 : i32
    return %c0_i32, %c0_i32_0 : i32, i32
  }
  func.func @transform_1(%arg0: i32) -> (i32, i32) {
    %c0_i32 = arith.constant 0 : i32
    %c0_i32_0 = arith.constant 0 : i32
    %c0_i32_1 = arith.constant 0 : i32
    return %c0_i32, %c0_i32_0 : i32, i32
  }
}

module attributes {stable_mosaic.version = 11 : i64} {
  func.func @_fused_mlp_kernel(%arg0: i32, %arg1: memref<8x128xf32, #tpu.memory_space<vmem>>, %arg2: memref<128x128xf32, #tpu.memory_space<vmem>>, %arg3: memref<1x128xf32, #tpu.memory_space<vmem>>, %arg4: memref<128x128xf32, #tpu.memory_space<vmem>>, %arg5: memref<1x128xf32, #tpu.memory_space<vmem>>, %arg6: memref<128x128xf32, #tpu.memory_space<vmem>>, %arg7: memref<1x128xf32, #tpu.memory_space<vmem>>, %arg8: memref<8x128xf32, #tpu.memory_space<vmem>>) attributes {dimension_semantics = [#tpu.dimension_semantics<parallel>], iteration_bounds = array<i64: 1>, scalar_prefetch = 0 : i64, scratch_operands = 0 : i64, tpu.core_type = #tpu.core_type<tc>, window_params = [{transform_indices = @transform_0, window_bounds = array<i64: 8, 128>}, {pipeline_mode = #tpu.pipeline_mode<synchronous>, transform_indices = @transform_1, window_bounds = array<i64: 128, 128>}, {pipeline_mode = #tpu.pipeline_mode<synchronous>, transform_indices = @transform_2, window_bounds = array<i64: 1, 128>}, {pipeline_mode = #tpu.pipeline_mode<synchronous>, transform_indices = @transform_3, window_bounds = array<i64: 128, 128>}, {pipeline_mode = #tpu.pipeline_mode<synchronous>, transform_indices = @transform_4, window_bounds = array<i64: 1, 128>}, {pipeline_mode = #tpu.pipeline_mode<synchronous>, transform_indices = @transform_5, window_bounds = array<i64: 128, 128>}, {pipeline_mode = #tpu.pipeline_mode<synchronous>, transform_indices = @transform_6, window_bounds = array<i64: 1, 128>}, {transform_indices = @transform_7, window_bounds = array<i64: 8, 128>}]} {
    %c0 = arith.constant 0 : index
    %c0_0 = arith.constant 0 : index
    %0 = vector.load %arg1[%c0, %c0_0] : memref<8x128xf32, #tpu.memory_space<vmem>>, vector<8x128xf32>
    %c0_1 = arith.constant 0 : index
    %c0_2 = arith.constant 0 : index
    %1 = vector.load %arg2[%c0_1, %c0_2] : memref<128x128xf32, #tpu.memory_space<vmem>>, vector<128x128xf32>
    %c0_3 = arith.constant 0 : index
    %c0_4 = arith.constant 0 : index
    %2 = vector.load %arg3[%c0_3, %c0_4] : memref<1x128xf32, #tpu.memory_space<vmem>>, vector<1x128xf32>
    %cst = arith.constant dense<0.000000e+00> : vector<8x128xf32>
    %3 = tpu.matmul %0, %1, %cst {dimension_numbers = #tpu.dot_dimension_numbers<[1], [0], [0], [1], [0, 0, 1, 1], [], []>} : vector<8x128xf32>, vector<128x128xf32>, vector<8x128xf32> -> vector<8x128xf32>
    %4 = vector.broadcast %2 : vector<1x128xf32> to vector<8x128xf32>
    %5 = arith.addf %3, %4 : vector<8x128xf32>
    %cst_5 = arith.constant 5.000000e-01 : f32
    %6 = vector.broadcast %cst_5 : f32 to vector<8x128xf32>
    %7 = arith.mulf %6, %5 : vector<8x128xf32>
    %8 = math.tanh %7 : vector<8x128xf32>
    %cst_6 = arith.constant 1.000000e+00 : f32
    %9 = vector.broadcast %cst_6 : f32 to vector<8x128xf32>
    %10 = arith.addf %8, %9 : vector<8x128xf32>
    %cst_7 = arith.constant 5.000000e-01 : f32
    %11 = vector.broadcast %cst_7 : f32 to vector<8x128xf32>
    %12 = arith.mulf %11, %10 : vector<8x128xf32>
    %13 = arith.mulf %5, %12 : vector<8x128xf32>
    %c0_8 = arith.constant 0 : index
    %c0_9 = arith.constant 0 : index
    %14 = vector.load %arg4[%c0_8, %c0_9] : memref<128x128xf32, #tpu.memory_space<vmem>>, vector<128x128xf32>
    %c0_10 = arith.constant 0 : index
    %c0_11 = arith.constant 0 : index
    %15 = vector.load %arg5[%c0_10, %c0_11] : memref<1x128xf32, #tpu.memory_space<vmem>>, vector<1x128xf32>
    %cst_12 = arith.constant dense<0.000000e+00> : vector<8x128xf32>
    %16 = tpu.matmul %13, %14, %cst_12 {dimension_numbers = #tpu.dot_dimension_numbers<[1], [0], [0], [1], [0, 0, 1, 1], [], []>} : vector<8x128xf32>, vector<128x128xf32>, vector<8x128xf32> -> vector<8x128xf32>
    %17 = vector.broadcast %15 : vector<1x128xf32> to vector<8x128xf32>
    %18 = arith.addf %16, %17 : vector<8x128xf32>
    %cst_13 = arith.constant 5.000000e-01 : f32
    %19 = vector.broadcast %cst_13 : f32 to vector<8x128xf32>
    %20 = arith.mulf %19, %18 : vector<8x128xf32>
    %21 = math.tanh %20 : vector<8x128xf32>
    %cst_14 = arith.constant 1.000000e+00 : f32
    %22 = vector.broadcast %cst_14 : f32 to vector<8x128xf32>
    %23 = arith.addf %21, %22 : vector<8x128xf32>
    %cst_15 = arith.constant 5.000000e-01 : f32
    %24 = vector.broadcast %cst_15 : f32 to vector<8x128xf32>
    %25 = arith.mulf %24, %23 : vector<8x128xf32>
    %26 = arith.mulf %18, %25 : vector<8x128xf32>
    %c0_16 = arith.constant 0 : index
    %c0_17 = arith.constant 0 : index
    %27 = vector.load %arg6[%c0_16, %c0_17] : memref<128x128xf32, #tpu.memory_space<vmem>>, vector<128x128xf32>
    %c0_18 = arith.constant 0 : index
    %c0_19 = arith.constant 0 : index
    %28 = vector.load %arg7[%c0_18, %c0_19] : memref<1x128xf32, #tpu.memory_space<vmem>>, vector<1x128xf32>
    %cst_20 = arith.constant dense<0.000000e+00> : vector<8x128xf32>
    %29 = tpu.matmul %26, %27, %cst_20 {dimension_numbers = #tpu.dot_dimension_numbers<[1], [0], [0], [1], [0, 0, 1, 1], [], []>} : vector<8x128xf32>, vector<128x128xf32>, vector<8x128xf32> -> vector<8x128xf32>
    %30 = vector.broadcast %28 : vector<1x128xf32> to vector<8x128xf32>
    %31 = arith.addf %29, %30 : vector<8x128xf32>
    %c0_21 = arith.constant 0 : index
    %c0_22 = arith.constant 0 : index
    %32 = vector.load %arg8[%c0_21, %c0_22] : memref<8x128xf32, #tpu.memory_space<vmem>>, vector<8x128xf32>
    tpu.vector_store %arg8[%c0_21, %c0_22], %31 {strides = array<i32>} : memref<8x128xf32, #tpu.memory_space<vmem>>, vector<8x128xf32>,
    return
  }
  func.func @transform_0(%arg0: i32) -> (i32, i32) {
    %c0_i32 = arith.constant 0 : i32
    %c0_i32_0 = arith.constant 0 : i32
    return %arg0, %c0_i32 : i32, i32
  }
  func.func @transform_1(%arg0: i32) -> (i32, i32) {
    %c0_i32 = arith.constant 0 : i32
    %c0_i32_0 = arith.constant 0 : i32
    %c0_i32_1 = arith.constant 0 : i32
    return %c0_i32, %c0_i32_0 : i32, i32
  }
  func.func @transform_2(%arg0: i32) -> (i32, i32) {
    %c0_i32 = arith.constant 0 : i32
    %c0_i32_0 = arith.constant 0 : i32
    %c0_i32_1 = arith.constant 0 : i32
    return %c0_i32, %c0_i32_0 : i32, i32
  }
  func.func @transform_3(%arg0: i32) -> (i32, i32) {
    %c0_i32 = arith.constant 0 : i32
    %c0_i32_0 = arith.constant 0 : i32
    %c0_i32_1 = arith.constant 0 : i32
    return %c0_i32, %c0_i32_0 : i32, i32
  }
  func.func @transform_4(%arg0: i32) -> (i32, i32) {
    %c0_i32 = arith.constant 0 : i32
    %c0_i32_0 = arith.constant 0 : i32
    %c0_i32_1 = arith.constant 0 : i32
    return %c0_i32, %c0_i32_0 : i32, i32
  }
  func.func @transform_5(%arg0: i32) -> (i32, i32) {
    %c0_i32 = arith.constant 0 : i32
    %c0_i32_0 = arith.constant 0 : i32
    %c0_i32_1 = arith.constant 0 : i32
    return %c0_i32, %c0_i32_0 : i32, i32
  }
  func.func @transform_6(%arg0: i32) -> (i32, i32) {
    %c0_i32 = arith.constant 0 : i32
    %c0_i32_0 = arith.constant 0 : i32
    %c0_i32_1 = arith.constant 0 : i32
    return %c0_i32, %c0_i32_0 : i32, i32
  }
  func.func @transform_7(%arg0: i32) -> (i32, i32) {
    %c0_i32 = arith.constant 0 : i32
    %c0_i32_0 = arith.constant 0 : i32
    return %arg0, %c0_i32 : i32, i32
  }
}

</mosaic_0001>

<bundles_post_ra>
// kernel: tpu_custom_call.1
= control target key start
LH: loop header
LB: loop body
LE: loop exit
PB: predicated region body
PF: predicated region fallthrough
CT: control target
= control target key end

     0   :  { %6 = vsyncpa [#allocation3], 0  ;;  %s341_s0 = inlined_call_operand.hbm [shape: f32[8,128], index: 0, kind: input, shape index: {}]   ;;  %s342_s1 = inlined_call_operand.hbm [shape: f32[8,128], index: 1, kind: output, shape index: {}]  }
   0x1   :  { %7 = vsyncpa [#allocation4], 0  ;;  %s262_s6 = smov 0  }
   0x2 LB: > { %s145_s7 = sadd.s32 4294967295, %s248_s6   ;;  %p146_p0 = scmp.ge.s32.totalorder %s248_s6, 1  ;;  %s248_s6 = sphi %s262_s6, %s13_s6  }
   0x3   : > { %p60_p1 = scmp.lt.s32.totalorder %s248_s6, 3  ;;  %p276_p3 = scmp.eq.s32.totalorder %s145_s7, 0 }
   0x4   : > { %s250_s10 = smov [#allocation2]   ;;  %s180_s15 = scalar_lea.hbm %s341_s0, 128 }
   0x5   : > { %p270_p2 = pnand %p146_p0, %p60_p1  ;;  %s73_s11 = sshll.u32 %s250_s10, 4  ;;  %s74_s11 = int_to_ptr.vmem [resolvable:$true] %s73_s11 }
   0x6   : > { %s347_s9 = scalar_select %p276_p3, 1, 0 }
   0x7   : > { %s346_s8 = scalar_select %p270_p2, 1, 0 }
   0x8   : > { %p162_p4 = pneg %p270_p2  ;;  %p181_p6 = scmp.ne.s32.totalorder %s341_s0, %s180_s15 }
   0x9   : > { %p187_p10 = scmp.lt.u32.totalorder %s180_s15, %s341_s0 }
   0xa   : > { %p284_p5 = pnand %p276_p3, %p162_p4 }
   0xc   : > { %p182_p7 = pneg %p284_p5 }
   0xe   : > { %p183_p8 = pnand %p182_p7, %p181_p6 }
  0x10   : > { %p184_p9 = pneg %p183_p8 }
  0x12   : > { %p189_p11 = pnand %p187_p10, %p184_p9 }
  0x14   : > { %192 = shalt.err (!%p189_p11)
}
  0x15   : > { %s193_s20 = scalar_lea.vmem %s74_s11, 128  ;;  %p201_p1 = scmp.lt.s32.totalorder %s74_s11, %s74_s11 }
  0x16   : > { %p194_p12 = scmp.ne.s32.totalorder %s74_s11, %s193_s20  ;;  %p202_p4 = scmp.lt.s32.totalorder %s193_s20, %s193_s20 }
  0x18   : > { %p196_p13 = pnand %p194_p12, %p182_p7  ;;  %p203_p3 = por %p202_p4, %p201_p1 }
  0x1a   : > { %p197_p0 = pneg %p196_p13 }
  0x1c   : > { %p204_p2 = pnand %p203_p3, %p197_p0 }
  0x1e   : > { %207 = shalt.err (!%p204_p2)
}
  0x1f   : > { %165 = dma.hbm_to_vmem [thread:$0]  (!%p284_p5), %s341_s0, 128, %s74_s11, [#allocation3]  }
  0x20   : > { %p349_p6 = scmp.ne.s32.totalorder %s346_s8, 0 }
  0x21   : > { %p350_p8 = scmp.ne.s32.totalorder (!%p349_p6), %s347_s9, 0 }
  0x22   : > { %86 = sbr.rel (%p349_p6) target bundleno = 67 (0x43), region = 24 }
  0x29   : > { %239 = dma.done.wait (%p350_p8), [#allocation3], 128  }
  0x2a   : > { %241 = vsyncadd (%p350_p8), [#allocation3], 4294967168  ;;  %s251_s23 = smov [#allocation5]   ;;  %v96_v0 = vld [vmem:[#allocation2] sm:$0xff]  ;;  %p312_p2 = scmp.eq.s32.totalorder %s145_s7, 1 }
  0x2b   : > { %s106_s24 = sshll.u32 %s251_s23, 4  ;;  %v97_v1 = vadd.f32 1.0, %v96_v0  ;;  %s107_s24 = int_to_ptr.vmem [resolvable:$true] %s106_s24 }
  0x2c   : > { %s208_s26 = scalar_lea.vmem %s107_s24, 128  ;;  %p215_p9 = scmp.lt.s32.totalorder %s107_s24, %s107_s24 }
  0x2d   : > { %98 = vst [vmem:[#allocation5] sm:$0xff] %v97_v1  ;;  %p209_p3 = scmp.ne.s32.totalorder %s107_s24, %s208_s26  ;;  %p216_p10 = scmp.lt.s32.totalorder %s208_s26, %s208_s26 }
  0x2f   : > { %p210_p5 = pnand %p209_p3, %p312_p2  ;;  %p217_p11 = por %p216_p10, %p215_p9 }
  0x31   : > { %p211_p7 = pneg %p210_p5 }
  0x33   : > { %p218_p12 = pnand %p217_p11, %p211_p7 }
  0x35   : > { %221 = shalt.err (!%p218_p12)
}
  0x36   : > { %s222_s29 = scalar_lea.hbm %s342_s1, 128 }
  0x37   : > { %p223_p13 = scmp.ne.s32.totalorder %s342_s1, %s222_s29  ;;  %p228_p4 = scmp.lt.u32.totalorder %s222_s29, %s342_s1 }
  0x39   : > { %p224_p0 = pnand %p223_p13, %p312_p2 }
  0x3b   : > { %p225_p1 = pneg %p224_p0 }
  0x3d   : > { %p230_p6 = pnand %p228_p4, %p225_p1 }
  0x3f   : > { %233 = shalt.err (!%p230_p6)
}
  0x40   : > { %159 = dma.vmem_to_hbm [thread:$0]  (%p312_p2), %s107_s24, 128, %s342_s1, [#allocation4]  }
  0x41   : > { %243 = dma.done.wait (%p312_p2), [#allocation4], 128  }
  0x42   : > { %245 = vsyncadd (%p312_p2), [#allocation4], 4294967168 }
  0x43 PF: > { %s13_s6 = sadd.s32 1, %s248_s6  }
  0x44   : > { %p10_p8 = scmp.ge.s32.totalorder %s13_s6, 4  }
  0x46   :  { %12 = sbr.rel (!%p10_p8) target bundleno = 2 (0x2), region = 53 }
  0x4d   :  { %119 = vsyncpa [#allocation3], 1 }
  0x4e   :  { %121 = vsyncpa [#allocation3 + $0x1], 1 }
  0x4f   :  { %122 = vsyncpa [#allocation4], 1 }
  0x50   :  { %124 = vsyncpa [#allocation4 + $0x1], 1 }

// kernel: tpu_custom_call.1
= control target key start
LH: loop header
LB: loop body
LE: loop exit
PB: predicated region body
PF: predicated region fallthrough
CT: control target
= control target key end

     0   :  { %12 = vsyncpa [#allocation3], 0  ;;  %s906_s0 = inlined_call_operand.hbm [shape: f32[8,128], index: 0, kind: input, shape index: {}]   ;;  %s907_s1 = inlined_call_operand.hbm [shape: f32[128,128], index: 1, kind: input, shape index: {}]   ;;  %s908_s2 = inlined_call_operand.vmem [shape: f32[1,128], index: 2, kind: input, shape index: {}]   ;;  %s909_s3 = inlined_call_operand.hbm [shape: f32[128,128], index: 3, kind: input, shape index: {}]   ;;  %s910_s4 = inlined_call_operand.vmem [shape: f32[1,128], index: 4, kind: input, shape index: {}]   ;;  %s911_s5 = inlined_call_operand.hbm [shape: f32[128,128], index: 5, kind: input, shape index: {}]   ;;  %s912_s6 = inlined_call_operand.vmem [shape: f32[1,128], index: 6, kind: input, shape index: {}]   ;;  %s913_s7 = inlined_call_operand.hbm [shape: f32[8,128], index: 7, kind: output, shape index: {}]  }
   0x1   :  { %13 = vsyncpa [#allocation6], 0 }
   0x2   :  { %14 = vsyncpa [#allocation9], 0 }
   0x3   :  { %15 = vsyncpa [#allocation4], 0  ;;  %s751_s24 = smov [#allocation5]   ;;  %s633_s28 = scalar_lea.hbm %s907_s1, 2048 }
   0x4   :  { %s31_s25 = sshll.u32 %s751_s24, 4  ;;  %p634_p0 = scmp.ne.s32.totalorder %s907_s1, %s633_s28  ;;  %s32_s25 = int_to_ptr.vmem [resolvable:$true] %s31_s25 }
   0x5   :  { %p637_p1 = scmp.lt.u32.totalorder %s633_s28, %s907_s1 }
   0x7   :  { %p639_p2 = pnand %p637_p1, %p634_p0 }
   0x9   :  { %642 = shalt.err (!%p639_p2)
}
   0xa   :  { %s643_s10 = scalar_lea.vmem %s32_s25, 2048  ;;  %p648_p4 = scmp.lt.s32.totalorder %s32_s25, %s32_s25 }
   0xb   :  { %p644_p3 = scmp.ne.s32.totalorder %s32_s25, %s643_s10  ;;  %p649_p5 = scmp.lt.s32.totalorder %s643_s10, %s643_s10 }
   0xd   :  { %p650_p6 = por %p649_p5, %p648_p4 }
   0xf   :  { %p651_p7 = pnand %p650_p6, %p644_p3 }
  0x11   :  { %654 = shalt.err (!%p651_p7)
}
  0x12   :  { %s752_s11 = smov 128   ;;  %s753_s12 = smov 8  }
  0x13   :  { %37 = dma.hbm_to_vmem [thread:$0]  %s907_s1, 2048, %s32_s25, [#allocation6], %s752_s11, %s752_s11, %s753_s12  }
  0x14   :  { %s754_s15 = smov [#allocation2]   ;;  %s755_s17 = smov [#allocation7]  }
  0x15   :  { %s22_s16 = sshll.u32 %s754_s15, 4  ;;  %s45_s18 = sshll.u32 %s755_s17, 4  ;;  %s23_s16 = int_to_ptr.vmem [resolvable:$true] %s22_s16  ;;  %s46_s18 = int_to_ptr.vmem [resolvable:$true] %s45_s18 }
  0x16   :  { %s655_s21 = scalar_lea.hbm %s906_s0, 128 }
  0x17   :  { %p656_p8 = scmp.ne.s32.totalorder %s906_s0, %s655_s21  ;;  %p659_p9 = scmp.lt.u32.totalorder %s655_s21, %s906_s0 }
  0x19   :  { %p661_p10 = pnand %p659_p9, %p656_p8 }
  0x1b   :  { %664 = shalt.err (!%p661_p10)
}
  0x1c   :  { %s665_s1 = scalar_lea.vmem %s23_s16, 128  ;;  %p670_p12 = scmp.lt.s32.totalorder %s23_s16, %s23_s16 }
  0x1d   :  { %p666_p11 = scmp.ne.s32.totalorder %s23_s16, %s665_s1  ;;  %p671_p13 = scmp.lt.s32.totalorder %s665_s1, %s665_s1 }
  0x1f   :  { %p672_p0 = por %p671_p13, %p670_p12 }
  0x21   :  { %p673_p1 = pnand %p672_p0, %p666_p11 }
  0x23   :  { %676 = shalt.err (!%p673_p1)
}
  0x24   :  { %25 = dma.hbm_to_vmem [thread:$0]  %s906_s0, 128, %s23_s16, [#allocation3]  }
  0x25   :  { %s677_s30 = scalar_lea.hbm %s909_s3, 2048 }
  0x26   :  { %p678_p2 = scmp.ne.s32.totalorder %s909_s3, %s677_s30  ;;  %p681_p3 = scmp.lt.u32.totalorder %s677_s30, %s909_s3 }
  0x28   :  { %p683_p4 = pnand %p681_p3, %p678_p2 }
  0x2a   :  { %686 = shalt.err (!%p683_p4)
}
  0x2b   :  { %s687_s14 = scalar_lea.vmem %s46_s18, 2048  ;;  %p692_p6 = scmp.lt.s32.totalorder %s46_s18, %s46_s18 }
  0x2c   :  { %p688_p5 = scmp.ne.s32.totalorder %s46_s18, %s687_s14  ;;  %p693_p7 = scmp.lt.s32.totalorder %s687_s14, %s687_s14 }
  0x2e   :  { %p694_p8 = por %p693_p7, %p692_p6 }
  0x30   :  { %p695_p9 = pnand %p694_p8, %p688_p5 }
  0x32   :  { %698 = shalt.err (!%p695_p9)
}
  0x33   :  { %51 = dma.hbm_to_vmem [thread:$0]  %s909_s3, 2048, %s46_s18, [#allocation6], %s752_s11, %s752_s11, %s753_s12  }
  0x34   :  { %s756_s16 = smov [#allocation8]   ;;  %s699_s21 = scalar_lea.hbm %s911_s5, 2048 }
  0x35   :  { %s59_s17 = sshll.u32 %s756_s16, 4  ;;  %p700_p10 = scmp.ne.s32.totalorder %s911_s5, %s699_s21  ;;  %s60_s17 = int_to_ptr.vmem [resolvable:$true] %s59_s17 }
  0x36   :  { %p703_p11 = scmp.lt.u32.totalorder %s699_s21, %s911_s5 }
  0x38   :  { %p705_p12 = pnand %p703_p11, %p700_p10 }
  0x3a   :  { %708 = shalt.err (!%p705_p12)
}
  0x3b   :  { %s709_s1 = scalar_lea.vmem %s60_s17, 2048  ;;  %p714_p0 = scmp.lt.s32.totalorder %s60_s17, %s60_s17 }
  0x3c   :  { %p710_p13 = scmp.ne.s32.totalorder %s60_s17, %s709_s1  ;;  %p715_p1 = scmp.lt.s32.totalorder %s709_s1, %s709_s1 }
  0x3e   :  { %p716_p2 = por %p715_p1, %p714_p0 }
  0x40   :  { %p717_p3 = pnand %p716_p2, %p710_p13 }
  0x42   :  { %720 = shalt.err (!%p717_p3)
}
  0x43   :  { %65 = dma.hbm_to_vmem [thread:$0]  %s911_s5, 2048, %s60_s17, [#allocation9], %s752_s11, %s752_s11, %s753_s12  }
  0x44   :  { %743 = dma.done.wait [#allocation3], 128  }
  0x45   :  { %744 = vsyncadd [#allocation3], 4294967168 }
  0x46   :  { %745 = dma.done.wait [#allocation6], 4096  }
  0x47   :  { %746 = vsyncadd [#allocation6], 4294963200 }
  0x48   :  { %747 = dma.done.wait [#allocation9], 2048  }
  0x49   :  { %748 = vsyncadd [#allocation9], 4294965248  ;;  %v757_v0 = vmov 0.0|0.0   ;;  %vm758_vm0 = vmmov 0   ;;  %v759_v1 = vmov 0.0   ;;  %v81_v2 = vld [vmem:[#allocation5] sm:$0xff] }
  0x4a   :  { %547 = vmatprep.subr.bf16.mxu0 %v757_v0  ;;  %474 = vmatprep.mubr.msk.f32.mxu0 %vm758_vm0, %v759_v1  ;;  %v82_v3 = vld [vmem:[#allocation5 + $0x8] sm:$0xff]  ;;  %v83_v4 = vld [vmem:[#allocation5 + $0x10] sm:$0xff]  ;;  %v84_v6 = vld [vmem:[#allocation5 + $0x18] sm:$0xff]  ;;  %s760_s28 = smov [#allocation10]  }
  0x4b   :  { %571 = vmatprep.subr.bf16.mxu1 %v757_v0  ;;  %509 = vmatprep.mubr.msk.f32.mxu1 %vm758_vm0, %v759_v1  ;;  %v548_v5 = vpack.c.bf16 %v82_v3, %v81_v2  ;;  %v551_v7 = vpack.c.bf16 %v84_v6, %v83_v4  ;;  %v85_v8 = vld [vmem:[#allocation5 + $0x20] sm:$0xff]  ;;  %v86_v9 = vld [vmem:[#allocation5 + $0x28] sm:$0xff]  ;;  %v181_v12 = vld [vmem:[#allocation7 + $0x10] sm:$0xff]  ;;  %s377_s29 = sshll.u32 %s760_s28, 4  ;;  %s378_s29 = int_to_ptr.vmem [resolvable:$true] %s377_s29 }
  0x4c   :  { %v179_v10 = vld [vmem:[#allocation7] sm:$0xff]  ;;  %v180_v11 = vld [vmem:[#allocation7 + $0x8] sm:$0xff]  ;;  %v182_v13 = vld [vmem:[#allocation7 + $0x18] sm:$0xff]  ;;  %v554_v14 = vpack.c.bf16 %v86_v9, %v85_v8  ;;  %p726_p5 = scmp.lt.s32.totalorder %s378_s29, %s378_s29 }
  0x4d   :  { %549 = vmatpush3.bf16.msra.mxu0 %v548_v5  ;;  %v572_v15 = vpack.c.bf16 %v180_v11, %v179_v10  ;;  %v87_v16 = vld [vmem:[#allocation5 + $0x30] sm:$0xff]  ;;  %v88_v17 = vld [vmem:[#allocation5 + $0x38] sm:$0xff]  ;;  %v575_v18 = vpack.c.bf16 %v182_v13, %v181_v12  ;;  %v183_v19 = vld [vmem:[#allocation7 + $0x20] sm:$0xff] }
  0x4e   :  { %550 = vmatprep.subr.bf16.mxu0 %v757_v0  ;;  %v184_v20 = vld [vmem:[#allocation7 + $0x28] sm:$0xff]  ;;  %v557_v21 = vpack.c.bf16 %v88_v17, %v87_v16  ;;  %v89_v22 = vld [vmem:[#allocation5 + $0x40] sm:$0xff]  ;;  %v91_v26 = vld [vmem:[#allocation5 + $0x50] sm:$0xff] }
  0x4f   :  { %573 = vmatpush3.bf16.msra.mxu1 %v572_v15  ;;  %v90_v23 = vld [vmem:[#allocation5 + $0x48] sm:$0xff]  ;;  %v578_v24 = vpack.c.bf16 %v184_v20, %v183_v19  ;;  %v92_v27 = vld [vmem:[#allocation5 + $0x58] sm:$0xff]  ;;  %v93_v29 = vld [vmem:[#allocation5 + $0x60] sm:$0xff] }
  0x50   :  { %574 = vmatprep.subr.bf16.mxu1 %v757_v0  ;;  %v560_v25 = vpack.c.bf16 %v90_v23, %v89_v22  ;;  %v563_v28 = vpack.c.bf16 %v92_v27, %v91_v26  ;;  %v94_v30 = vld [vmem:[#allocation5 + $0x68] sm:$0xff]  ;;  %v95_v32 = vld [vmem:[#allocation5 + $0x70] sm:$0xff]  ;;  %v96_v33 = vld [vmem:[#allocation5 + $0x78] sm:$0xff] }
  0x51   :  { %552 = vmatpush3.bf16.msra.mxu0 %v551_v7  ;;  %v566_v31 = vpack.c.bf16 %v94_v30, %v93_v29  ;;  %v569_v34 = vpack.c.bf16 %v96_v33, %v95_v32  ;;  %v80_v35 = vld [vmem:[#allocation2] sm:$0xff]  ;;  %v185_v36 = vld [vmem:[#allocation7 + $0x30] sm:$0xff]  ;;  %v187_v39 = vld [vmem:[#allocation7 + $0x40] sm:$0xff] }
  0x52   :  { %553 = vmatprep.subr.bf16.mxu0 %v757_v0  ;;  %v186_v37 = vld [vmem:[#allocation7 + $0x38] sm:$0xff]  ;;  %v188_v40 = vld [vmem:[#allocation7 + $0x48] sm:$0xff]  ;;  %v189_v42 = vld [vmem:[#allocation7 + $0x50] sm:$0xff] }
  0x53   :  { %576 = vmatpush3.bf16.msra.mxu1 %v575_v18  ;;  %v581_v38 = vpack.c.bf16 %v186_v37, %v185_v36  ;;  %v584_v41 = vpack.c.bf16 %v188_v40, %v187_v39  ;;  %v190_v43 = vld [vmem:[#allocation7 + $0x58] sm:$0xff]  ;;  %v191_v45 = vld [vmem:[#allocation7 + $0x60] sm:$0xff]  ;;  %v192_v46 = vld [vmem:[#allocation7 + $0x68] sm:$0xff] }
  0x54   :  { %577 = vmatprep.subr.bf16.mxu1 %v757_v0  ;;  %v587_v44 = vpack.c.bf16 %v190_v43, %v189_v42  ;;  %v590_v47 = vpack.c.bf16 %v192_v46, %v191_v45  ;;  %v193_v48 = vld [vmem:[#allocation7 + $0x70] sm:$0xff]  ;;  %v194_v49 = vld [vmem:[#allocation7 + $0x78] sm:$0xff]  ;;  %v277_v51 = vld [vmem:[#allocation8] sm:$0xff] }
  0x55   :  { %555 = vmatpush3.bf16.msra.mxu0 %v554_v14  ;;  %v593_v50 = vpack.c.bf16 %v194_v49, %v193_v48  ;;  %v278_v52 = vld [vmem:[#allocation8 + $0x8] sm:$0xff]  ;;  %v279_v53 = vld [vmem:[#allocation8 + $0x10] sm:$0xff]  ;;  %v280_v55 = vld [vmem:[#allocation8 + $0x18] sm:$0xff] }
  0x56   :  { %556 = vmatprep.subr.bf16.mxu0 %v757_v0  ;;  %v596_v54 = vpack.c.bf16 %v278_v52, %v277_v51  ;;  %v599_v56 = vpack.c.bf16 %v280_v55, %v279_v53  ;;  %v281_v57 = vld [vmem:[#allocation8 + $0x20] sm:$0xff]  ;;  %v282_v58 = vld [vmem:[#allocation8 + $0x28] sm:$0xff]  ;;  %v388_v60 = vld [vmem:[%s908_s2] ss:$0 sm:$0xff] }
  0x57   :  { %579 = vmatpush3.bf16.msra.mxu1 %v578_v24  ;;  %v602_v59 = vpack.c.bf16 %v282_v58, %v281_v57  ;;  %v283_v6 = vld [vmem:[#allocation8 + $0x30] sm:$0xff]  ;;  %v284_v7 = vld [vmem:[#allocation8 + $0x38] sm:$0xff]  ;;  %v285_v9 = vld [vmem:[#allocation8 + $0x40] sm:$0xff] }
  0x58   :  { %580 = vmatprep.subr.bf16.mxu1 %v757_v0  ;;  %v605_v8 = vpack.c.bf16 %v284_v7, %v283_v6  ;;  %v286_v10 = vld [vmem:[#allocation8 + $0x48] sm:$0xff]  ;;  %v287_v12 = vld [vmem:[#allocation8 + $0x50] sm:$0xff]  ;;  %v288_v13 = vld [vmem:[#allocation8 + $0x58] sm:$0xff] }
  0x59   :  { %558 = vmatpush3.bf16.msra.mxu0 %v557_v21  ;;  %v608_v11 = vpack.c.bf16 %v286_v10, %v285_v9  ;;  %v611_v14 = vpack.c.bf16 %v288_v13, %v287_v12  ;;  %v289_v15 = vld [vmem:[#allocation8 + $0x60] sm:$0xff]  ;;  %v290_v16 = vld [vmem:[#allocation8 + $0x68] sm:$0xff]  ;;  %v291_v18 = vld [vmem:[#allocation8 + $0x70] sm:$0xff] }
  0x5a   :  { %559 = vmatprep.subr.bf16.mxu0 %v757_v0  ;;  %v614_v17 = vpack.c.bf16 %v290_v16, %v289_v15  ;;  %v292_v19 = vld [vmem:[#allocation8 + $0x78] sm:$0xff] }
  0x5b   :  { %582 = vmatpush3.bf16.msra.mxu1 %v581_v38  ;;  %v617_v20 = vpack.c.bf16 %v292_v19, %v291_v18  ;;  %v389_v21 = vld [vmem:[%s910_s4] ss:$0 sm:$0xff]  ;;  %s721_s4 = scalar_lea.vmem %s378_s29, 128 }
  0x5c   :  { %583 = vmatprep.subr.bf16.mxu1 %v757_v0  ;;  %p722_p4 = scmp.ne.s32.totalorder %s378_s29, %s721_s4  ;;  %p727_p6 = scmp.lt.s32.totalorder %s721_s4, %s721_s4 }
  0x5d   :  { %561 = vmatpush3.bf16.msra.mxu0 %v560_v25 }
  0x5e   :  { %562 = vmatprep.subr.bf16.mxu0 %v757_v0  ;;  %p728_p7 = por %p727_p6, %p726_p5 }
  0x5f   :  { %585 = vmatpush3.bf16.msra.mxu1 %v584_v41 }
  0x60   :  { %586 = vmatprep.subr.bf16.mxu1 %v757_v0  ;;  %p729_p8 = pnand %p728_p7, %p722_p4 }
  0x61   :  { %564 = vmatpush3.bf16.msra.mxu0 %v563_v28 }
  0x62   :  { %565 = vmatprep.subr.bf16.mxu0 %v757_v0 }
  0x63   :  { %588 = vmatpush3.bf16.msra.mxu1 %v587_v44 }
  0x64   :  { %589 = vmatprep.subr.bf16.mxu1 %v757_v0 }
  0x65   :  { %567 = vmatpush3.bf16.msra.mxu0 %v566_v31 }
  0x66   :  { %568 = vmatprep.subr.bf16.mxu0 %v757_v0 }
  0x67   :  { %591 = vmatpush3.bf16.msra.mxu1 %v590_v47 }
  0x68   :  { %592 = vmatprep.subr.bf16.mxu1 %v757_v0 }
  0x69   :  { %570 = vmatpush3.bf16.msra.mxu0 %v569_v34 }
  0x6a   :  { %595 = vmatprep.subr.bf16.mxu0 %v757_v0 }
  0x6b   :  { %594 = vmatpush3.bf16.msra.mxu1 %v593_v50 }
  0x6c   :  { %475 = vmatmul.mubr.f32.vlgmr.msra.gmra.mrb[0].mxu0 %v80_v35 }
  0x6d   :  { %544 = vmatprep.mubr.msk.f32.mxu0 %vm758_vm0, %v759_v1  ;;  %597 = vmatpush3.bf16.msra.mxu0 %v596_v54 }
  0x6e   :  { %598 = vmatprep.subr.bf16.mxu0 %v757_v0 }
  0x71   :  { %600 = vmatpush3.bf16.msra.mxu0 %v599_v56 }
  0x72   :  { %601 = vmatprep.subr.bf16.mxu0 %v757_v0 }
  0x75   :  { %603 = vmatpush3.bf16.msra.mxu0 %v602_v59 }
  0x76   :  { %604 = vmatprep.subr.bf16.mxu0 %v757_v0 }
  0x79   :  { %606 = vmatpush3.bf16.msra.mxu0 %v605_v8 }
  0x7a   :  { %607 = vmatprep.subr.bf16.mxu0 %v757_v0 }
  0x7d   :  { %609 = vmatpush3.bf16.msra.mxu0 %v608_v11 }
  0x7e   :  { %610 = vmatprep.subr.bf16.mxu0 %v757_v0 }
  0x81   :  { %612 = vmatpush3.bf16.msra.mxu0 %v611_v14 }
  0x82   :  { %613 = vmatprep.subr.bf16.mxu0 %v757_v0 }
  0x85   :  { %615 = vmatpush3.bf16.msra.mxu0 %v614_v17 }
  0x86   :  { %616 = vmatprep.subr.bf16.mxu0 %v757_v0  ;;  %v390_v0 = vld [vmem:[%s912_s6] ss:$0 sm:$0xff] }
  0x89   :  { %618 = vmatpush3.bf16.msra.mxu0 %v617_v20 }
 0x13f   :  { %v170_v61 = vpop.f32.mrb[0].mxu0 }
 0x140   :  { %v171_v62 = vadd.f32 %v388_v60, %v170_v61  ;;  %v476_v63 = vpop.f32.mrb[1].mxu0 }
 0x142   :  { %v174_v1 = vmul.f32 0.5, %v171_v62 }
 0x144   :  { %629 = vtanh.f32 %v174_v1 }
 0x14e   :  { %v630_v2 = vpop.eup %629 }
 0x14f   :  { %v176_v3 = vadd.f32 1.0, %v630_v2 }
 0x151   :  { %v177_v4 = vmul.f32 0.5, %v176_v3 }
 0x153   :  { %v178_v5 = vmul.f32 %v177_v4, %v171_v62 }
 0x155   :  { %510 = vmatmul.mubr.f32.vlgmr.msra.gmra.mrb[0].mxu1 %v178_v5 }
 0x228   :  { %v268_v22 = vpop.f32.mrb[0].mxu1 }
 0x229   :  { %v269_v23 = vadd.f32 %v389_v21, %v268_v22  ;;  %v511_v24 = vpop.f32.mrb[1].mxu1 }
 0x22b   :  { %v272_v25 = vmul.f32 0.5, %v269_v23 }
 0x22d   :  { %631 = vtanh.f32 %v272_v25 }
 0x237   :  { %v632_v26 = vpop.eup %631 }
 0x238   :  { %v274_v27 = vadd.f32 1.0, %v632_v26 }
 0x23a   :  { %v275_v28 = vmul.f32 0.5, %v274_v27 }
 0x23c   :  { %v276_v29 = vmul.f32 %v275_v28, %v269_v23 }
 0x23e   :  { %545 = vmatmul.mubr.f32.vlgmr.msra.gmra.mrb[2].mxu0 %v276_v29 }
 0x311   :  { %v366_v30 = vpop.f32.mrb[2].mxu0 }
 0x312   :  { %v367_v31 = vadd.f32 %v390_v0, %v366_v30  ;;  %v546_v32 = vpop.f32.mrb[3].mxu0 }
 0x314   :  { %370 = vst [vmem:[#allocation10] sm:$0xff] %v367_v31 }
 0x315   :  { %732 = shalt.err (!%p729_p8)
}
 0x316   :  { %s733_s9 = scalar_lea.hbm %s913_s7, 128 }
 0x317   :  { %p734_p9 = scmp.ne.s32.totalorder %s913_s7, %s733_s9  ;;  %p737_p10 = scmp.lt.u32.totalorder %s733_s9, %s913_s7 }
 0x319   :  { %p739_p11 = pnand %p737_p10, %p734_p9 }
 0x31b   :  { %742 = shalt.err (!%p739_p11)
}
 0x31c   :  { %380 = dma.vmem_to_hbm [thread:$0]  %s378_s29, 128, %s913_s7, [#allocation4]  }
 0x31d   :  { %749 = dma.done.wait [#allocation4], 128  }
 0x31e   :  { %750 = vsyncadd [#allocation4], 4294967168 }
 0x31f   :  { %384 = vsyncpa [#allocation3], 1 }
 0x320   :  { %385 = vsyncpa [#allocation6], 1 }
 0x321   :  { %386 = vsyncpa [#allocation9], 1 }
 0x322   :  { %387 = vsyncpa [#allocation4], 1 }

</bundles_post_ra>
